<compile_context>
chip_gen: v7x
topology: tpu7x:2x2x1
jax: 0.10.0
libtpu: 0.0.40
codegen_flags: <defaults>
</compile_context>

<pallas_src>
import math

import jax
import jax.numpy as jnp
import numpy as np
from jax.experimental import pallas as pl
from jax.experimental.pallas import tpu as pltpu

# ----------------------------- config ---------------------------------------
DIM = 32          # attention dim C
N_HEADS = 4       # number of heads H
HEAD_DIM = DIM // N_HEADS
LANES = 128       # TPU vreg lane width


def _round_up(x, m):
    return (x + m - 1) // m * m


# ----------------------------- kernel ---------------------------------------
def _class_attn_kernel(xcls_ref, u_ref, bias_ref,
                       wq_ref, wk_ref, wv_ref, hsum_ref, wo_ref,
                       bq_ref, bk_ref, bv_ref, bo_ref,
                       o_ref):
    BR, Seq, CL = u_ref.shape          # CL = G*C = 128 (lane-packed)

    xcls = xcls_ref[...]                              # (BR, CL)       f32
    u2 = u_ref[...].reshape(BR * Seq, CL)             # (BR*Seq, CL)   f32

    wq = wq_ref[...]; wk = wk_ref[...]; wv = wv_ref[...]
    hsum = hsum_ref[...]; wo = wo_ref[...]
    mxu_t = wq.dtype                                  # bf16 by default

    x_lo = xcls.astype(mxu_t)
    u_lo = u2.astype(mxu_t)

    # Lane-dense (K = 128) MXU projections, f32 accumulation, f32 bias add.
    q = jnp.dot(x_lo, wq, preferred_element_type=jnp.float32) + bq_ref[...]   # (BR, CL)
    k = jnp.dot(u_lo, wk, preferred_element_type=jnp.float32) + bk_ref[...]   # (BR*Seq, CL)
    v = jnp.dot(u_lo, wv, preferred_element_type=jnp.float32) + bv_ref[...]   # (BR*Seq, CL)

    k3 = k.reshape(BR, Seq, CL)
    v3 = v.reshape(BR, Seq, CL)

    # Per-head, per-packed-group scores replicated across each head's lanes:
    #   prod[i,j,l] = q[i,l] * k[i,j,l]                          (VPU, f32)
    #   s = prod @ hsum   (hsum block-diag over groups & heads, pre-scaled)
    prod = (q[:, None, :] * k3).reshape(BR * Seq, CL)
    s = jnp.dot(prod.astype(mxu_t), hsum,
                preferred_element_type=jnp.float32).reshape(BR, Seq, CL)

    # Key-padding mask as a precomputed additive bias (0 valid / -1e30 padded).
    s = s + bias_ref[...]

    # Numerically stable softmax over the key axis (axis=1), all f32.
    m = jnp.max(s, axis=1, keepdims=True)             # (BR, 1, CL)
    p = jnp.exp(s - m)
    denom = jnp.sum(p, axis=1, keepdims=True)
    p = p * pl.reciprocal(denom, approx=True)

    attn = jnp.sum(p * v3, axis=1)                    # (BR, CL)

    y = jnp.dot(attn.astype(mxu_t), wo,
                preferred_element_type=jnp.float32) + bo_ref[...]
    o_ref[...] = y                                    # lane-dense (BR, 128) store


# ----------------------------- wrapper ---------------------------------------
def class_attention(u, x_cls, seq_masks, params, *, n_heads=N_HEADS,
                    block_rows=256, mxu_dtype=jnp.bfloat16):
    """Pallas implementation of ClassAttention.forward.

    u:         (bs, SJ, Seq, C)
    x_cls:     (bs, SJ, 1, C)
    seq_masks: (bs, SJ, Seq)  (0 == padded key)
    returns:   (bs, SJ, 1, C)
    """
    bs, SJ, Seq, C = u.shape
    B = bs * SJ
    assert C % n_heads == 0
    head_dim = C // n_heads

    # Lane-packing factor: pack G flattened-batch rows into the 128 lanes.
    if C >= LANES:
        G = 1
    else:
        assert LANES % C == 0, "attention dim must divide 128 for lane packing"
        G = LANES // C
    CL = G * C

    u_f = u.reshape(B, Seq, C).astype(jnp.float32)
    x_f = x_cls.reshape(B, C).astype(jnp.float32)
    m_f = seq_masks.reshape(B, Seq).astype(jnp.float32)

    # Packed-row block size: aim for >=2 grid steps (v7x megacore) but cap the
    # block for VMEM (block_rows=256 packed rows == 1024 flattened-batch rows,
    # ~13 MiB of blocks+intermediates per step -> fits v5e/v6e/v7x).
    R0 = -(-B // G)
    if R0 <= 8:
        BR = R0
    else:
        BR = min(block_rows, _round_up(-(-R0 // 2), 8))
    R = _round_up(R0, BR)
    Bg = R * G
    pad = Bg - B
    if pad:
        # padded rows are fully masked -> numerically harmless, sliced off below
        u_f = jnp.pad(u_f, ((0, pad), (0, 0), (0, 0)))
        x_f = jnp.pad(x_f, ((0, pad), (0, 0)))
        m_f = jnp.pad(m_f, ((0, pad), (0, 0)))

    # --- pack G batch rows per 128 lanes -------------------------------------
    x_p = x_f.reshape(R, G, C).reshape(R, CL)                                  # (R, 128)
    u_p = u_f.reshape(R, G, Seq, C).transpose(0, 2, 1, 3).reshape(R, Seq, CL)  # (R, Seq, 128)

    # Additive key-padding bias laid out exactly like the scores.
    bias = jnp.where(m_f != 0.0, jnp.float32(0.0), jnp.float32(-1e30))         # (Bg, Seq)
    bias_p = bias.reshape(R, G, Seq).transpose(0, 2, 1)                        # (R, Seq, G)
    bias_p = jnp.broadcast_to(bias_p[..., None], (R, Seq, G, C)).reshape(R, Seq, CL)

    # --- block-diagonal replicated weights (shared across packed groups) -----
    eyeG = jnp.eye(G, dtype=jnp.float32)
    wq_p = jnp.kron(eyeG, params["wq"]).astype(mxu_dtype)
    wk_p = jnp.kron(eyeG, params["wk"]).astype(mxu_dtype)
    wv_p = jnp.kron(eyeG, params["wv"]).astype(mxu_dtype)
    wo_p = jnp.kron(eyeG, params["wo"]).astype(mxu_dtype)

    # Scaled head-sum matrix (folds in 1/sqrt(head_dim)), replicated per group.
    hid = np.arange(C) // head_dim
    hsum = (hid[:, None] == hid[None, :]).astype(np.float32) / math.sqrt(head_dim)
    hsum_p = jnp.kron(eyeG, jnp.asarray(hsum)).astype(mxu_dtype)

    bq_p = jnp.tile(params["bq"], (1, G)).astype(jnp.float32)
    bk_p = jnp.tile(params["bk"], (1, G)).astype(jnp.float32)
    bv_p = jnp.tile(params["bv"], (1, G)).astype(jnp.float32)
    bo_p = jnp.tile(params["bo"], (1, G)).astype(jnp.float32)

    batch2 = pl.BlockSpec((BR, CL), lambda i: (i, 0))
    batch3 = pl.BlockSpec((BR, Seq, CL), lambda i: (i, 0, 0))
    w_spec = pl.BlockSpec((CL, CL), lambda i: (0, 0))
    b_spec = pl.BlockSpec((1, CL), lambda i: (0, 0))

    out = pl.pallas_call(
        _class_attn_kernel,
        out_shape=jax.ShapeDtypeStruct((R, CL), jnp.float32),
        grid_spec=pltpu.PrefetchScalarGridSpec(
            num_scalar_prefetch=0,
            grid=(R // BR,),
            in_specs=[
                batch2,            # x_cls packed
                batch3,            # u packed
                batch3,            # additive key-padding bias packed
                w_spec,            # Wq  (block-diag replicated)
                w_spec,            # Wk
                w_spec,            # Wv
                w_spec,            # head-sum (scaled, block-diag)
                w_spec,            # Wo
                b_spec,            # bq
                b_spec,            # bk
                b_spec,            # bv
                b_spec,            # bo
            ],
            out_specs=pl.BlockSpec((BR, CL), lambda i: (i, 0)),
        ),
        compiler_params=pltpu.CompilerParams(
            dimension_semantics=("parallel",),
            vmem_limit_bytes=48 * 1024 * 1024),
    )(x_p, u_p, bias_p, wq_p, wk_p, wv_p, hsum_p, wo_p, bq_p, bk_p, bv_p, bo_p)

    out = out.reshape(R * G, C)[:B]          # unpack lanes -> flattened batch
    return out.reshape(bs, SJ, 1, C)


# ----------------------------- reference (plain JAX, f32) ---------------------
def class_attention_ref(u, x_cls, seq_masks, params, *, n_heads=N_HEADS):
    bs, SJ, Seq, C = u.shape
    B = bs * SJ
    Dh = C // n_heads
    uf = u.reshape(B, Seq, C).astype(jnp.float32)
    xf = x_cls.reshape(B, 1, C).astype(jnp.float32)
    mf = seq_masks.reshape(B, Seq).astype(jnp.float32)

    q = xf @ params["wq"] + params["bq"]
    k = uf @ params["wk"] + params["bk"]
    v = uf @ params["wv"] + params["bv"]

    qh = q.reshape(B, 1, n_heads, Dh).transpose(0, 2, 1, 3)
    kh = k.reshape(B, Seq, n_heads, Dh).transpose(0, 2, 1, 3)
    vh = v.reshape(B, Seq, n_heads, Dh).transpose(0, 2, 1, 3)

    s = jnp.einsum("bhqd,bhkd->bhqk", qh, kh) / math.sqrt(Dh)
    s = jnp.where(mf[:, None, None, :] != 0, s, -1e30)
    p = jax.nn.softmax(s, axis=-1)
    o = jnp.einsum("bhqk,bhkd->bhqd", p, vh)
    o = o.transpose(0, 2, 1, 3).reshape(B, 1, C)
    y = o @ params["wo"] + params["bo"]
    return y.reshape(bs, SJ, 1, C)


# ----------------------------- parameter init --------------------------------
def init_params(key, dim):
    ks = jax.random.split(key, 8)
    scale = 1.0 / math.sqrt(dim)
    # Weights stored as (C, C) right-multiplication matrices (i.e. W^T of the
    # PyTorch in_proj / out_proj weights).
    return {
        "wq": jax.random.normal(ks[0], (dim, dim), jnp.float32) * scale,
        "wk": jax.random.normal(ks[1], (dim, dim), jnp.float32) * scale,
        "wv": jax.random.normal(ks[2], (dim, dim), jnp.float32) * scale,
        "bq": jax.random.normal(ks[3], (1, dim), jnp.float32) * 0.02,
        "bk": jax.random.normal(ks[4], (1, dim), jnp.float32) * 0.02,
        "bv": jax.random.normal(ks[5], (1, dim), jnp.float32) * 0.02,
        "wo": jax.random.normal(ks[6], (dim, dim), jnp.float32) * scale,
        "bo": jax.random.normal(ks[7], (1, dim), jnp.float32) * 0.02,
    }


# ----------------------------- main -------------------------------------------
if __name__ == "__main__":
    # small shapes consistent with the forward pass
    bs, SJ, Seq, C = 2, 2, 8, DIM

    key = jax.random.PRNGKey(0)
    k_u, k_cls, k_mask, k_par = jax.random.split(key, 4)

    u = jax.random.normal(k_u, (bs, SJ, Seq, C), jnp.float32)
    x_cls = jax.random.normal(k_cls, (bs, SJ, 1, C), jnp.float32)

    # 0/1 padding masks; guarantee at least one valid key per sequence
    seq_masks = jax.random.bernoulli(k_mask, 0.7, (bs, SJ, Seq)).astype(jnp.float32)
    seq_masks = seq_masks.at[..., 0].set(1.0)

    params = init_params(k_par, C)

    out = class_attention(u, x_cls, seq_masks, params)
    out = jax.block_until_ready(out)

    ref = class_attention_ref(u, x_cls, seq_masks, params)
    assert out.shape == (bs, SJ, 1, C)
    # tolerance accounts for bf16 MXU inputs (f32 accumulation / f32 softmax)
    # and the EUP approximate reciprocal in the softmax denominator.
    err = jnp.max(jnp.abs(out - ref))
    assert jnp.allclose(out, ref, atol=5e-2, rtol=5e-2), f"max abs err {err}"

    print("KERNEL_OK")
</pallas_src>

<mosaic_0001>
module attributes {stable_mosaic.version = 11 : i64} {
  func.func @_class_attn_kernel(%arg0: i32, %arg1: memref<1x128xf32, #tpu.memory_space<vmem>>, %arg2: memref<1x8x128xf32, #tpu.memory_space<vmem>>, %arg3: memref<1x8x128xf32, #tpu.memory_space<vmem>>, %arg4: memref<128x128xbf16, #tpu.memory_space<vmem>>, %arg5: memref<128x128xbf16, #tpu.memory_space<vmem>>, %arg6: memref<128x128xbf16, #tpu.memory_space<vmem>>, %arg7: memref<128x128xbf16, #tpu.memory_space<vmem>>, %arg8: memref<128x128xbf16, #tpu.memory_space<vmem>>, %arg9: memref<1x128xf32, #tpu.memory_space<vmem>>, %arg10: memref<1x128xf32, #tpu.memory_space<vmem>>, %arg11: memref<1x128xf32, #tpu.memory_space<vmem>>, %arg12: memref<1x128xf32, #tpu.memory_space<vmem>>, %arg13: memref<1x128xf32, #tpu.memory_space<vmem>>) attributes {dimension_semantics = [#tpu.dimension_semantics<parallel>], iteration_bounds = array<i64: 1>, scalar_prefetch = 0 : i64, scratch_operands = 0 : i64, tpu.core_type = #tpu.core_type<tc>, window_params = [{transform_indices = @transform_0, window_bounds = array<i64: 1, 128>}, {transform_indices = @transform_1, window_bounds = array<i64: 1, 8, 128>}, {transform_indices = @transform_2, window_bounds = array<i64: 1, 8, 128>}, {pipeline_mode = #tpu.pipeline_mode<synchronous>, transform_indices = @transform_3, window_bounds = array<i64: 128, 128>}, {pipeline_mode = #tpu.pipeline_mode<synchronous>, transform_indices = @transform_4, window_bounds = array<i64: 128, 128>}, {pipeline_mode = #tpu.pipeline_mode<synchronous>, transform_indices = @transform_5, window_bounds = array<i64: 128, 128>}, {pipeline_mode = #tpu.pipeline_mode<synchronous>, transform_indices = @transform_6, window_bounds = array<i64: 128, 128>}, {pipeline_mode = #tpu.pipeline_mode<synchronous>, transform_indices = @transform_7, window_bounds = array<i64: 128, 128>}, {pipeline_mode = #tpu.pipeline_mode<synchronous>, transform_indices = @transform_8, window_bounds = array<i64: 1, 128>}, {pipeline_mode = #tpu.pipeline_mode<synchronous>, transform_indices = @transform_9, window_bounds = array<i64: 1, 128>}, {pipeline_mode = #tpu.pipeline_mode<synchronous>, transform_indices = @transform_10, window_bounds = array<i64: 1, 128>}, {pipeline_mode = #tpu.pipeline_mode<synchronous>, transform_indices = @transform_11, window_bounds = array<i64: 1, 128>}, {transform_indices = @transform_12, window_bounds = array<i64: 1, 128>}]} {
    %c0 = arith.constant 0 : index
    %c0_0 = arith.constant 0 : index
    %0 = vector.load %arg1[%c0, %c0_0] : memref<1x128xf32, #tpu.memory_space<vmem>>, vector<1x128xf32>
    %c0_1 = arith.constant 0 : index
    %c0_2 = arith.constant 0 : index
    %c0_3 = arith.constant 0 : index
    %1 = vector.load %arg2[%c0_1, %c0_2, %c0_3] : memref<1x8x128xf32, #tpu.memory_space<vmem>>, vector<1x8x128xf32>
    %2 = vector.shape_cast %1 : vector<1x8x128xf32> to vector<8x128xf32>
    %c0_4 = arith.constant 0 : index
    %c0_5 = arith.constant 0 : index
    %3 = vector.load %arg4[%c0_4, %c0_5] : memref<128x128xbf16, #tpu.memory_space<vmem>>, vector<128x128xbf16>
    %c0_6 = arith.constant 0 : index
    %c0_7 = arith.constant 0 : index
    %4 = vector.load %arg5[%c0_6, %c0_7] : memref<128x128xbf16, #tpu.memory_space<vmem>>, vector<128x128xbf16>
    %c0_8 = arith.constant 0 : index
    %c0_9 = arith.constant 0 : index
    %5 = vector.load %arg6[%c0_8, %c0_9] : memref<128x128xbf16, #tpu.memory_space<vmem>>, vector<128x128xbf16>
    %c0_10 = arith.constant 0 : index
    %c0_11 = arith.constant 0 : index
    %6 = vector.load %arg7[%c0_10, %c0_11] : memref<128x128xbf16, #tpu.memory_space<vmem>>, vector<128x128xbf16>
    %c0_12 = arith.constant 0 : index
    %c0_13 = arith.constant 0 : index
    %7 = vector.load %arg8[%c0_12, %c0_13] : memref<128x128xbf16, #tpu.memory_space<vmem>>, vector<128x128xbf16>
    %8 = arith.truncf %0 : vector<1x128xf32> to vector<1x128xbf16>
    %9 = arith.truncf %2 : vector<8x128xf32> to vector<8x128xbf16>
    %cst = arith.constant dense<0.000000e+00> : vector<1x128xf32>
    %10 = tpu.matmul %8, %3, %cst {dimension_numbers = #tpu.dot_dimension_numbers<[1], [0], [0], [1], [0, 0, 1, 1], [], []>} : vector<1x128xbf16>, vector<128x128xbf16>, vector<1x128xf32> -> vector<1x128xf32>
    %c0_14 = arith.constant 0 : index
    %c0_15 = arith.constant 0 : index
    %11 = vector.load %arg9[%c0_14, %c0_15] : memref<1x128xf32, #tpu.memory_space<vmem>>, vector<1x128xf32>
    %12 = arith.addf %10, %11 : vector<1x128xf32>
    %cst_16 = arith.constant dense<0.000000e+00> : vector<8x128xf32>
    %13 = tpu.matmul %9, %4, %cst_16 {dimension_numbers = #tpu.dot_dimension_numbers<[1], [0], [0], [1], [0, 0, 1, 1], [], []>} : vector<8x128xbf16>, vector<128x128xbf16>, vector<8x128xf32> -> vector<8x128xf32>
    %c0_17 = arith.constant 0 : index
    %c0_18 = arith.constant 0 : index
    %14 = vector.load %arg10[%c0_17, %c0_18] : memref<1x128xf32, #tpu.memory_space<vmem>>, vector<1x128xf32>
    %15 = vector.broadcast %14 : vector<1x128xf32> to vector<8x128xf32>
    %16 = arith.addf %13, %15 : vector<8x128xf32>
    %cst_19 = arith.constant dense<0.000000e+00> : vector<8x128xf32>
    %17 = tpu.matmul %9, %5, %cst_19 {dimension_numbers = #tpu.dot_dimension_numbers<[1], [0], [0], [1], [0, 0, 1, 1], [], []>} : vector<8x128xbf16>, vector<128x128xbf16>, vector<8x128xf32> -> vector<8x128xf32>
    %c0_20 = arith.constant 0 : index
    %c0_21 = arith.constant 0 : index
    %18 = vector.load %arg11[%c0_20, %c0_21] : memref<1x128xf32, #tpu.memory_space<vmem>>, vector<1x128xf32>
    %19 = vector.broadcast %18 : vector<1x128xf32> to vector<8x128xf32>
    %20 = arith.addf %17, %19 : vector<8x128xf32>
    %21 = vector.shape_cast %16 : vector<8x128xf32> to vector<1x8x128xf32>
    %22 = vector.shape_cast %20 : vector<8x128xf32> to vector<1x8x128xf32>
    %23 = vector.shape_cast %12 : vector<1x128xf32> to vector<1x1x128xf32>
    %24 = vector.broadcast %23 : vector<1x1x128xf32> to vector<1x8x128xf32>
    %25 = arith.mulf %24, %21 : vector<1x8x128xf32>
    %26 = vector.shape_cast %25 : vector<1x8x128xf32> to vector<8x128xf32>
    %27 = arith.truncf %26 : vector<8x128xf32> to vector<8x128xbf16>
    %cst_22 = arith.constant dense<0.000000e+00> : vector<8x128xf32>
    %28 = tpu.matmul %27, %6, %cst_22 {dimension_numbers = #tpu.dot_dimension_numbers<[1], [0], [0], [1], [0, 0, 1, 1], [], []>} : vector<8x128xbf16>, vector<128x128xbf16>, vector<8x128xf32> -> vector<8x128xf32>
    %29 = vector.shape_cast %28 : vector<8x128xf32> to vector<1x8x128xf32>
    %c0_23 = arith.constant 0 : index
    %c0_24 = arith.constant 0 : index
    %c0_25 = arith.constant 0 : index
    %30 = vector.load %arg3[%c0_23, %c0_24, %c0_25] : memref<1x8x128xf32, #tpu.memory_space<vmem>>, vector<1x8x128xf32>
    %31 = arith.addf %29, %30 : vector<1x8x128xf32>
    %cst_26 = arith.constant dense<0xFF800000> : vector<1x128xf32>
    %32 = vector.multi_reduction <maximumf>, %31, %cst_26 [1] : vector<1x8x128xf32> to vector<1x128xf32>
    %33 = vector.shape_cast %32 : vector<1x128xf32> to vector<1x1x128xf32>
    %34 = vector.broadcast %33 : vector<1x1x128xf32> to vector<1x8x128xf32>
    %35 = arith.subf %31, %34 : vector<1x8x128xf32>
    %36 = math.exp %35 : vector<1x8x128xf32>
    %cst_27 = arith.constant dense<0.000000e+00> : vector<1x128xf32>
    %37 = vector.multi_reduction <add>, %36, %cst_27 [1] : vector<1x8x128xf32> to vector<1x128xf32>
    %38 = vector.shape_cast %37 : vector<1x128xf32> to vector<1x1x128xf32>
    %39 = tpu.reciprocal %38 {approx = true} : vector<1x1x128xf32> -> vector<1x1x128xf32>
    %40 = vector.broadcast %39 : vector<1x1x128xf32> to vector<1x8x128xf32>
    %41 = arith.mulf %36, %40 : vector<1x8x128xf32>
    %42 = arith.mulf %41, %22 : vector<1x8x128xf32>
    %cst_28 = arith.constant dense<0.000000e+00> : vector<1x128xf32>
    %43 = vector.multi_reduction <add>, %42, %cst_28 [1] : vector<1x8x128xf32> to vector<1x128xf32>
    %44 = arith.truncf %43 : vector<1x128xf32> to vector<1x128xbf16>
    %cst_29 = arith.constant dense<0.000000e+00> : vector<1x128xf32>
    %45 = tpu.matmul %44, %7, %cst_29 {dimension_numbers = #tpu.dot_dimension_numbers<[1], [0], [0], [1], [0, 0, 1, 1], [], []>} : vector<1x128xbf16>, vector<128x128xbf16>, vector<1x128xf32> -> vector<1x128xf32>
    %c0_30 = arith.constant 0 : index
    %c0_31 = arith.constant 0 : index
    %46 = vector.load %arg12[%c0_30, %c0_31] : memref<1x128xf32, #tpu.memory_space<vmem>>, vector<1x128xf32>
    %47 = arith.addf %45, %46 : vector<1x128xf32>
    %c0_32 = arith.constant 0 : index
    %c0_33 = arith.constant 0 : index
    %48 = vector.load %arg13[%c0_32, %c0_33] : memref<1x128xf32, #tpu.memory_space<vmem>>, vector<1x128xf32>
    tpu.vector_store %arg13[%c0_32, %c0_33], %47 {strides = array<i32>} : memref<1x128xf32, #tpu.memory_space<vmem>>, vector<1x128xf32>,
    return
  }
  func.func @transform_0(%arg0: i32) -> (i32, i32) {
    %c0_i32 = arith.constant 0 : i32
    %c0_i32_0 = arith.constant 0 : i32
    return %arg0, %c0_i32 : i32, i32
  }
  func.func @transform_1(%arg0: i32) -> (i32, i32, i32) {
    %c0_i32 = arith.constant 0 : i32
    %c0_i32_0 = arith.constant 0 : i32
    %c0_i32_1 = arith.constant 0 : i32
    return %arg0, %c0_i32, %c0_i32_0 : i32, i32, i32
  }
  func.func @transform_2(%arg0: i32) -> (i32, i32, i32) {
    %c0_i32 = arith.constant 0 : i32
    %c0_i32_0 = arith.constant 0 : i32
    %c0_i32_1 = arith.constant 0 : i32
    return %arg0, %c0_i32, %c0_i32_0 : i32, i32, i32
  }
  func.func @transform_3(%arg0: i32) -> (i32, i32) {
    %c0_i32 = arith.constant 0 : i32
    %c0_i32_0 = arith.constant 0 : i32
    %c0_i32_1 = arith.constant 0 : i32
    return %c0_i32, %c0_i32_0 : i32, i32
  }
  func.func @transform_4(%arg0: i32) -> (i32, i32) {
    %c0_i32 = arith.constant 0 : i32
    %c0_i32_0 = arith.constant 0 : i32
    %c0_i32_1 = arith.constant 0 : i32
    return %c0_i32, %c0_i32_0 : i32, i32
  }
  func.func @transform_5(%arg0: i32) -> (i32, i32) {
    %c0_i32 = arith.constant 0 : i32
    %c0_i32_0 = arith.constant 0 : i32
    %c0_i32_1 = arith.constant 0 : i32
    return %c0_i32, %c0_i32_0 : i32, i32
  }
  func.func @transform_6(%arg0: i32) -> (i32, i32) {
    %c0_i32 = arith.constant 0 : i32
    %c0_i32_0 = arith.constant 0 : i32
    %c0_i32_1 = arith.constant 0 : i32
    return %c0_i32, %c0_i32_0 : i32, i32
  }
  func.func @transform_7(%arg0: i32) -> (i32, i32) {
    %c0_i32 = arith.constant 0 : i32
    %c0_i32_0 = arith.constant 0 : i32
    %c0_i32_1 = arith.constant 0 : i32
    return %c0_i32, %c0_i32_0 : i32, i32
  }
  func.func @transform_8(%arg0: i32) -> (i32, i32) {
    %c0_i32 = arith.constant 0 : i32
    %c0_i32_0 = arith.constant 0 : i32
    %c0_i32_1 = arith.constant 0 : i32
    return %c0_i32, %c0_i32_0 : i32, i32
  }
  func.func @transform_9(%arg0: i32) -> (i32, i32) {
    %c0_i32 = arith.constant 0 : i32
    %c0_i32_0 = arith.constant 0 : i32
    %c0_i32_1 = arith.constant 0 : i32
    return %c0_i32, %c0_i32_0 : i32, i32
  }
  func.func @transform_10(%arg0: i32) -> (i32, i32) {
    %c0_i32 = arith.constant 0 : i32
    %c0_i32_0 = arith.constant 0 : i32
    %c0_i32_1 = arith.constant 0 : i32
    return %c0_i32, %c0_i32_0 : i32, i32
  }
  func.func @transform_11(%arg0: i32) -> (i32, i32) {
    %c0_i32 = arith.constant 0 : i32
    %c0_i32_0 = arith.constant 0 : i32
    %c0_i32_1 = arith.constant 0 : i32
    return %c0_i32, %c0_i32_0 : i32, i32
  }
  func.func @transform_12(%arg0: i32) -> (i32, i32) {
    %c0_i32 = arith.constant 0 : i32
    %c0_i32_0 = arith.constant 0 : i32
    return %arg0, %c0_i32 : i32, i32
  }
}

</mosaic_0001>

<bundles_post_ra>
// kernel: tpu_custom_call.1
= control target key start
LH: loop header
LB: loop body
LE: loop exit
PB: predicated region body
PF: predicated region fallthrough
CT: control target
= control target key end

     0   :  { %17 = vsyncpa [#allocation3], 0  ;;  %s1477_s0 = inlined_call_operand.hbm [shape: f32[1,128], index: 0, kind: input, shape index: {}]   ;;  %s1478_s1 = inlined_call_operand.hbm [shape: f32[1,8,128], index: 1, kind: input, shape index: {}]   ;;  %s1479_s2 = inlined_call_operand.hbm [shape: f32[1,8,128], index: 2, kind: input, shape index: {}]   ;;  %s1480_s3 = inlined_call_operand.hbm [shape: bf16[128,128], index: 3, kind: input, shape index: {}]   ;;  %s1481_s4 = inlined_call_operand.hbm [shape: bf16[128,128], index: 4, kind: input, shape index: {}]   ;;  %s1482_s5 = inlined_call_operand.hbm [shape: bf16[128,128], index: 5, kind: input, shape index: {}]   ;;  %s1483_s6 = inlined_call_operand.hbm [shape: bf16[128,128], index: 6, kind: input, shape index: {}]   ;;  %s1484_s7 = inlined_call_operand.hbm [shape: bf16[128,128], index: 7, kind: input, shape index: {}]   ;;  %s1485_s8 = inlined_call_operand.vmem [shape: f32[1,128], index: 8, kind: input, shape index: {}]   ;;  %s1486_s9 = inlined_call_operand.vmem [shape: f32[1,128], index: 9, kind: input, shape index: {}]   ;;  %s1487_s10 = inlined_call_operand.vmem [shape: f32[1,128], index: 10, kind: input, shape index: {}]   ;;  %s1488_s11 = inlined_call_operand.vmem [shape: f32[1,128], index: 11, kind: input, shape index: {}]   ;;  %s1489_s12 = inlined_call_operand.hbm [shape: f32[1,128], index: 12, kind: output, shape index: {}]  }
   0x1   :  { %18 = vsyncpa [#allocation6], 0 }
   0x2   :  { %19 = vsyncpa [#allocation9], 0 }
   0x3   :  { %20 = vsyncpa [#allocation12], 0 }
   0x4   :  { %21 = vsyncpa [#allocation15], 0 }
   0x5   :  { %22 = vsyncpa [#allocation4], 0  ;;  %s1193_s21 = smov [#allocation5]   ;;  %s1194_s23 = smov [#allocation8]  }
   0x6   :  { %s39_s22 = sshll.u32 %s1193_s21, 4  ;;  %s58_s24 = sshll.u32 %s1194_s23, 4  ;;  %s40_s22 = int_to_ptr.vmem [resolvable:$true] %s39_s22  ;;  %s1271_s24 = int_to_ptr.vmem [resolvable:$true] %s58_s24 }
   0x7   :  { %s983_s27 = scalar_lea.hbm %s1478_s1, 128 }
   0x8   :  { %p984_p0 = scmp.ne.s32.totalorder %s1478_s1, %s983_s27  ;;  %p987_p1 = scmp.lt.u32.totalorder %s983_s27, %s1478_s1 }
   0xa   :  { %p989_p2 = pnand %p987_p1, %p984_p0 }
   0xc   :  { %992 = shalt.err (!%p989_p2)
}
   0xd   :  { %s993_s14 = scalar_lea.vmem %s40_s22, 128  ;;  %p998_p4 = scmp.lt.s32.totalorder %s40_s22, %s40_s22 }
   0xe   :  { %p994_p3 = scmp.ne.s32.totalorder %s40_s22, %s993_s14  ;;  %p999_p5 = scmp.lt.s32.totalorder %s993_s14, %s993_s14 }
  0x10   :  { %p1000_p6 = por %p999_p5, %p998_p4 }
  0x12   :  { %p1001_p7 = pnand %p1000_p6, %p994_p3 }
  0x14   :  { %1004 = shalt.err (!%p1001_p7)
}
  0x15   :  { %42 = dma.hbm_to_vmem [thread:$0]  %s1478_s1, 128, %s40_s22, [#allocation6]  }
  0x16   :  { %s1005_s19 = scalar_lea.hbm %s1480_s3, 1024 }
  0x17   :  { %p1006_p8 = scmp.ne.s32.totalorder %s1480_s3, %s1005_s19  ;;  %p1009_p9 = scmp.lt.u32.totalorder %s1005_s19, %s1480_s3 }
  0x19   :  { %p1011_p10 = pnand %p1009_p9, %p1006_p8 }
  0x1b   :  { %1014 = shalt.err (!%p1011_p10)
}
  0x1c   :  { %s1015_s26 = scalar_lea.vmem %s1271_s24, 1024  ;;  %p1020_p12 = scmp.lt.s32.totalorder %s1271_s24, %s1271_s24 }
  0x1d   :  { %p1016_p11 = scmp.ne.s32.totalorder %s1271_s24, %s1015_s26  ;;  %p1021_p13 = scmp.lt.s32.totalorder %s1015_s26, %s1015_s26 }
  0x1f   :  { %p1022_p0 = por %p1021_p13, %p1020_p12 }
  0x21   :  { %p1023_p1 = pnand %p1022_p0, %p1016_p11 }
  0x23   :  { %1026 = shalt.err (!%p1023_p1)
}
  0x24   :  { %s1195_s1 = smov 64   ;;  %s1196_s22 = smov 4  }
  0x25   :  { %64 = dma.hbm_to_vmem [thread:$0]  %s1480_s3, 1024, %s1271_s24, [#allocation9], %s1195_s1, %s1195_s1, %s1196_s22  }
  0x26   :  { %s1197_s29 = smov [#allocation11]   ;;  %s1198_s13 = smov [#allocation2]  }
  0x27   :  { %s82_s30 = sshll.u32 %s1197_s29, 4  ;;  %s29_s14 = sshll.u32 %s1198_s13, 4  ;;  %s83_s30 = int_to_ptr.vmem [resolvable:$true] %s82_s30  ;;  %s30_s14 = int_to_ptr.vmem [resolvable:$true] %s29_s14 }
  0x28   :  { %s1027_s17 = scalar_lea.hbm %s1482_s5, 1024 }
  0x29   :  { %p1028_p2 = scmp.ne.s32.totalorder %s1482_s5, %s1027_s17  ;;  %p1031_p3 = scmp.lt.u32.totalorder %s1027_s17, %s1482_s5 }
  0x2b   :  { %p1033_p4 = pnand %p1031_p3, %p1028_p2 }
  0x2d   :  { %1036 = shalt.err (!%p1033_p4)
}
  0x2e   :  { %s1037_s3 = scalar_lea.vmem %s83_s30, 1024  ;;  %p1042_p6 = scmp.lt.s32.totalorder %s83_s30, %s83_s30 }
  0x2f   :  { %p1038_p5 = scmp.ne.s32.totalorder %s83_s30, %s1037_s3  ;;  %p1043_p7 = scmp.lt.s32.totalorder %s1037_s3, %s1037_s3 }
  0x31   :  { %p1044_p8 = por %p1043_p7, %p1042_p6 }
  0x33   :  { %p1045_p9 = pnand %p1044_p8, %p1038_p5 }
  0x35   :  { %1048 = shalt.err (!%p1045_p9)
}
  0x36   :  { %88 = dma.hbm_to_vmem [thread:$0]  %s1482_s5, 1024, %s83_s30, [#allocation12], %s1195_s1, %s1195_s1, %s1196_s22  }
  0x37   :  { %s1049_s27 = scalar_lea.hbm %s1477_s0, 16 }
  0x38   :  { %p1050_p10 = scmp.ne.s32.totalorder %s1477_s0, %s1049_s27  ;;  %p1053_p11 = scmp.lt.u32.totalorder %s1049_s27, %s1477_s0 }
  0x3a   :  { %p1055_p12 = pnand %p1053_p11, %p1050_p10 }
  0x3c   :  { %1058 = shalt.err (!%p1055_p12)
}
  0x3d   :  { %s1059_s16 = scalar_lea.vmem %s30_s14, 16  ;;  %s1063_s17 = scalar_lea.vmem %s30_s14, 32 }
  0x3e   :  { %p1060_p13 = scmp.ne.s32.totalorder %s30_s14, %s1059_s16  ;;  %p1064_p0 = scmp.lt.s32.totalorder %s30_s14, %s30_s14 }
  0x3f   :  { %p1065_p1 = scmp.lt.s32.totalorder %s1063_s17, %s1059_s16 }
  0x41   :  { %p1066_p2 = por %p1065_p1, %p1064_p0 }
  0x43   :  { %p1067_p3 = pnand %p1066_p2, %p1060_p13 }
  0x45   :  { %1070 = shalt.err (!%p1067_p3)
}
  0x46   :  { %32 = dma.hbm_to_vmem [thread:$0]  %s1477_s0, 16, %s30_s14, [#allocation3]  }
  0x47   :  { %s1199_s18 = smov [#allocation7]   ;;  %s1200_s20 = smov [#allocation10]  }
  0x48   :  { %s49_s19 = sshll.u32 %s1199_s18, 4  ;;  %s70_s21 = sshll.u32 %s1200_s20, 4  ;;  %s50_s19 = int_to_ptr.vmem [resolvable:$true] %s49_s19  ;;  %s1332_s21 = int_to_ptr.vmem [resolvable:$true] %s70_s21 }
  0x49   :  { %s1071_s23 = scalar_lea.hbm %s1479_s2, 128 }
  0x4a   :  { %p1072_p4 = scmp.ne.s32.totalorder %s1479_s2, %s1071_s23  ;;  %p1075_p5 = scmp.lt.u32.totalorder %s1071_s23, %s1479_s2 }
  0x4c   :  { %p1077_p6 = pnand %p1075_p5, %p1072_p4 }
  0x4e   :  { %1080 = shalt.err (!%p1077_p6)
}
  0x4f   :  { %s1081_s0 = scalar_lea.vmem %s50_s19, 128  ;;  %p1086_p8 = scmp.lt.s32.totalorder %s50_s19, %s50_s19 }
  0x50   :  { %p1082_p7 = scmp.ne.s32.totalorder %s50_s19, %s1081_s0  ;;  %p1087_p9 = scmp.lt.s32.totalorder %s1081_s0, %s1081_s0 }
  0x52   :  { %p1088_p10 = por %p1087_p9, %p1086_p8 }
  0x54   :  { %p1089_p11 = pnand %p1088_p10, %p1082_p7 }
  0x56   :  { %1092 = shalt.err (!%p1089_p11)
}
  0x57   :  { %52 = dma.hbm_to_vmem [thread:$0]  %s1479_s2, 128, %s50_s19, [#allocation6]  }
  0x58   :  { %s1093_s16 = scalar_lea.hbm %s1481_s4, 1024 }
  0x59   :  { %p1094_p12 = scmp.ne.s32.totalorder %s1481_s4, %s1093_s16  ;;  %p1097_p13 = scmp.lt.u32.totalorder %s1093_s16, %s1481_s4 }
  0x5b   :  { %p1099_p0 = pnand %p1097_p13, %p1094_p12 }
  0x5d   :  { %1102 = shalt.err (!%p1099_p0)
}
  0x5e   :  { %s1103_s20 = scalar_lea.vmem %s1332_s21, 1024  ;;  %p1108_p2 = scmp.lt.s32.totalorder %s1332_s21, %s1332_s21 }
  0x5f   :  { %p1104_p1 = scmp.ne.s32.totalorder %s1332_s21, %s1103_s20  ;;  %p1109_p3 = scmp.lt.s32.totalorder %s1103_s20, %s1103_s20 }
  0x61   :  { %p1110_p4 = por %p1109_p3, %p1108_p2 }
  0x63   :  { %p1111_p5 = pnand %p1110_p4, %p1104_p1 }
  0x65   :  { %1114 = shalt.err (!%p1111_p5)
}
  0x66   :  { %76 = dma.hbm_to_vmem [thread:$0]  %s1481_s4, 1024, %s1332_s21, [#allocation9], %s1195_s1, %s1195_s1, %s1196_s22  }
  0x67   :  { %s1201_s3 = smov [#allocation13]   ;;  %s1202_s23 = smov [#allocation14]  }
  0x68   :  { %s94_s24 = sshll.u32 %s1201_s3, 4  ;;  %s106_s25 = sshll.u32 %s1202_s23, 4  ;;  %s95_s24 = int_to_ptr.vmem [resolvable:$true] %s94_s24  ;;  %s1366_s25 = int_to_ptr.vmem [resolvable:$true] %s106_s25 }
  0x69   :  { %s1115_s28 = scalar_lea.hbm %s1483_s6, 1024 }
  0x6a   :  { %p1116_p6 = scmp.ne.s32.totalorder %s1483_s6, %s1115_s28  ;;  %p1119_p7 = scmp.lt.u32.totalorder %s1115_s28, %s1483_s6 }
  0x6c   :  { %p1121_p8 = pnand %p1119_p7, %p1116_p6 }
  0x6e   :  { %1124 = shalt.err (!%p1121_p8)
}
  0x6f   :  { %s1125_s4 = scalar_lea.vmem %s95_s24, 1024  ;;  %p1130_p10 = scmp.lt.s32.totalorder %s95_s24, %s95_s24 }
  0x70   :  { %p1126_p9 = scmp.ne.s32.totalorder %s95_s24, %s1125_s4  ;;  %p1131_p11 = scmp.lt.s32.totalorder %s1125_s4, %s1125_s4 }
  0x72   :  { %p1132_p12 = por %p1131_p11, %p1130_p10 }
  0x74   :  { %p1133_p13 = pnand %p1132_p12, %p1126_p9 }
  0x76   :  { %1136 = shalt.err (!%p1133_p13)
}
  0x77   :  { %100 = dma.hbm_to_vmem [thread:$0]  %s1483_s6, 1024, %s95_s24, [#allocation12], %s1195_s1, %s1195_s1, %s1196_s22  }
  0x78   :  { %s1137_s5 = scalar_lea.hbm %s1484_s7, 1024 }
  0x79   :  { %p1138_p0 = scmp.ne.s32.totalorder %s1484_s7, %s1137_s5  ;;  %p1141_p1 = scmp.lt.u32.totalorder %s1137_s5, %s1484_s7 }
  0x7b   :  { %p1143_p2 = pnand %p1141_p1, %p1138_p0 }
  0x7d   :  { %1146 = shalt.err (!%p1143_p2)
}
  0x7e   :  { %s1147_s19 = scalar_lea.vmem %s1366_s25, 1024  ;;  %p1152_p4 = scmp.lt.s32.totalorder %s1366_s25, %s1366_s25 }
  0x7f   :  { %p1148_p3 = scmp.ne.s32.totalorder %s1366_s25, %s1147_s19  ;;  %p1153_p5 = scmp.lt.s32.totalorder %s1147_s19, %s1147_s19 }
  0x81   :  { %p1154_p6 = por %p1153_p5, %p1152_p4 }
  0x83   :  { %p1155_p7 = pnand %p1154_p6, %p1148_p3 }
  0x85   :  { %1158 = shalt.err (!%p1155_p7)
}
  0x86   :  { %112 = dma.hbm_to_vmem [thread:$0]  %s1484_s7, 1024, %s1366_s25, [#allocation15], %s1195_s1, %s1195_s1, %s1196_s22  }
  0x87   :  { %1181 = dma.done.wait [#allocation3], 16  }
  0x88   :  { %1182 = vsyncadd [#allocation3], 4294967280 }
  0x89   :  { %1183 = dma.done.wait [#allocation6], 256  }
  0x8a   :  { %1184 = vsyncadd [#allocation6], 4294967040 }
  0x8b   :  { %1185 = dma.done.wait [#allocation9], 2048  }
  0x8c   :  { %1186 = vsyncadd [#allocation9], 4294965248 }
  0x8d   :  { %1187 = dma.done.wait [#allocation12], 2048  }
  0x8e   :  { %1188 = vsyncadd [#allocation12], 4294965248 }
  0x8f   :  { %1189 = dma.done.wait [#allocation15], 1024  }
  0x90   :  { %1190 = vsyncadd [#allocation15], 4294966272  ;;  %v1203_v0 = vmov 0.0   ;;  %vm1204_vm0 = vmmov 0   ;;  %v939_v1 = vld [vmem:[#allocation8] sm:$0xff]   ;;  %v941_v3 = vld [vmem:[#allocation8 + $0x8] sm:$0xff]   ;;  %v509_v37 = vlaneseq }
  0x91   :  { %826 = vmatprep.subr.bf16.mxu0 %v1203_v0  ;;  %846 = vmatprep.subr.bf16.mxu1 %v1203_v0  ;;  %v940_v2 = vld [vmem:[#allocation10] sm:$0xff]   ;;  %v942_v4 = vld [vmem:[#allocation10 + $0x8] sm:$0xff]   ;;  %v943_v5 = vld [vmem:[#allocation8 + $0x10] sm:$0xff]   ;;  %s1205_s26 = smov [#allocation16]  }
  0x92   :  { %842 = vmatprep.mubr.msk.bf16.mxu0 %vm1204_vm0, %v1203_v0  ;;  %862 = vmatprep.mubr.msk.bf16.mxu1 %vm1204_vm0, %v1203_v0  ;;  %v944_v6 = vld [vmem:[#allocation10 + $0x10] sm:$0xff]   ;;  %v945_v7 = vld [vmem:[#allocation8 + $0x18] sm:$0xff]   ;;  %v947_v9 = vld [vmem:[#allocation8 + $0x20] sm:$0xff]   ;;  %v510_v38 = vshrl.u32 %v509_v37, 7  ;;  %s726_s27 = sshll.u32 %s1205_s26, 4  ;;  %s727_s27 = int_to_ptr.vmem [resolvable:$true] %s726_s27 }
  0x93   :  { %827 = vmatpush3.bf16.msra.mxu0 %v939_v1  ;;  %847 = vmatpush3.bf16.msra.mxu1 %v940_v2  ;;  %v946_v8 = vld [vmem:[#allocation10 + $0x18] sm:$0xff]   ;;  %v948_v10 = vld [vmem:[#allocation10 + $0x20] sm:$0xff]   ;;  %v949_v11 = vld [vmem:[#allocation8 + $0x28] sm:$0xff]   ;;  %s1163_s28 = scalar_lea.vmem %s727_s27, 32  ;;  %p1164_p9 = scmp.lt.s32.totalorder %s727_s27, %s727_s27 }
  0x94   :  { %828 = vmatprep.subr.bf16.mxu0 %v1203_v0  ;;  %848 = vmatprep.subr.bf16.mxu1 %v1203_v0  ;;  %v950_v12 = vld [vmem:[#allocation10 + $0x28] sm:$0xff]   ;;  %v951_v13 = vld [vmem:[#allocation8 + $0x30] sm:$0xff]   ;;  %v953_v15 = vld [vmem:[#allocation8 + $0x38] sm:$0xff]   ;;  %v511_v40 = vsub.s32 0, %v510_v38 }
  0x95   :  { %v952_v14 = vld [vmem:[#allocation10 + $0x30] sm:$0xff]   ;;  %v146_v16 = vld [vmem:[#allocation2] sm:$0x1]  ;;  %v954_v17 = vld [vmem:[#allocation10 + $0x38] sm:$0xff]  }
  0x96   :  { %v147_v18 = vld [vmem:[#allocation5] sm:$0xff]  ;;  %v228_v19 = vpack.c.bf16 %v146_v16, %v146_v16  ;;  %v955_v20 = vld [vmem:[#allocation13] sm:$0xff]   ;;  %v956_v22 = vld [vmem:[#allocation13 + $0x8] sm:$0xff]  }
  0x97   :  { %829 = vmatpush3.bf16.msra.mxu0 %v941_v3  ;;  %849 = vmatpush3.bf16.msra.mxu1 %v942_v4  ;;  %v229_v21 = vpack.c.bf16 %v147_v18, %v147_v18  ;;  %v957_v23 = vld [vmem:[#allocation13 + $0x10] sm:$0xff]   ;;  %v958_v24 = vld [vmem:[#allocation13 + $0x18] sm:$0xff]   ;;  %v959_v25 = vld [vmem:[#allocation13 + $0x20] sm:$0xff]  }
  0x98   :  { %830 = vmatprep.subr.bf16.mxu0 %v1203_v0  ;;  %850 = vmatprep.subr.bf16.mxu1 %v1203_v0  ;;  %v960_v26 = vld [vmem:[#allocation13 + $0x28] sm:$0xff]   ;;  %v961_v27 = vld [vmem:[#allocation13 + $0x30] sm:$0xff]   ;;  %v962_v28 = vld [vmem:[#allocation13 + $0x38] sm:$0xff]  }
  0x99   :  { %v963_v29 = vld [vmem:[#allocation11] sm:$0xff]   ;;  %v964_v30 = vld [vmem:[#allocation11 + $0x8] sm:$0xff]   ;;  %v965_v31 = vld [vmem:[#allocation11 + $0x10] sm:$0xff]  }
  0x9a   :  { %v966_v32 = vld [vmem:[#allocation11 + $0x18] sm:$0xff]   ;;  %v967_v33 = vld [vmem:[#allocation11 + $0x20] sm:$0xff]   ;;  %v968_v34 = vld [vmem:[#allocation11 + $0x28] sm:$0xff]  }
  0x9b   :  { %831 = vmatpush3.bf16.msra.mxu0 %v943_v5  ;;  %851 = vmatpush3.bf16.msra.mxu1 %v944_v6  ;;  %v969_v35 = vld [vmem:[#allocation11 + $0x30] sm:$0xff]   ;;  %v970_v36 = vld [vmem:[#allocation11 + $0x38] sm:$0xff]   ;;  %v230_v39 = vld [vmem:[%s1485_s8] sm:$0x1] }
  0x9c   :  { %832 = vmatprep.subr.bf16.mxu0 %v1203_v0  ;;  %852 = vmatprep.subr.bf16.mxu1 %v1203_v0  ;;  %v747_v41 = vld [vmem:[%s1486_s9] ss:$0 sm:$0xff]  ;;  %v971_v55 = vld [vmem:[#allocation14] sm:$0xff]   ;;  %v973_v57 = vld [vmem:[#allocation14 + $0x10] sm:$0xff]  }
  0x9d   :  { %v972_v56 = vld [vmem:[#allocation14 + $0x8] sm:$0xff]   ;;  %v974_v62 = vld [vmem:[#allocation14 + $0x18] sm:$0xff]   ;;  %v975_v63 = vld [vmem:[#allocation14 + $0x20] sm:$0xff]  }
  0x9e   :  { %v976_v1 = vld [vmem:[#allocation14 + $0x28] sm:$0xff]   ;;  %v977_v2 = vld [vmem:[#allocation14 + $0x30] sm:$0xff]   ;;  %v978_v3 = vld [vmem:[#allocation14 + $0x38] sm:$0xff]  }
  0x9f   :  { %833 = vmatpush3.bf16.msra.mxu0 %v945_v7  ;;  %853 = vmatpush3.bf16.msra.mxu1 %v946_v8  ;;  %v603_v4 = vld [vmem:[#allocation7] sm:$0xff] }
  0xa0   :  { %834 = vmatprep.subr.bf16.mxu0 %v1203_v0  ;;  %854 = vmatprep.subr.bf16.mxu1 %v1203_v0 }
  0xa3   :  { %835 = vmatpush3.bf16.msra.mxu0 %v947_v9  ;;  %855 = vmatpush3.bf16.msra.mxu1 %v948_v10 }
  0xa4   :  { %836 = vmatprep.subr.bf16.mxu0 %v1203_v0  ;;  %856 = vmatprep.subr.bf16.mxu1 %v1203_v0 }
  0xa7   :  { %837 = vmatpush3.bf16.msra.mxu0 %v949_v11  ;;  %857 = vmatpush3.bf16.msra.mxu1 %v950_v12 }
  0xa8   :  { %838 = vmatprep.subr.bf16.mxu0 %v1203_v0  ;;  %858 = vmatprep.subr.bf16.mxu1 %v1203_v0 }
  0xab   :  { %839 = vmatpush3.bf16.msra.mxu0 %v951_v13  ;;  %859 = vmatpush3.bf16.msra.mxu1 %v952_v14 }
  0xac   :  { %840 = vmatprep.subr.bf16.mxu0 %v1203_v0  ;;  %860 = vmatprep.subr.bf16.mxu1 %v1203_v0 }
  0xaf   :  { %841 = vmatpush3.bf16.msra.mxu0 %v953_v15  ;;  %861 = vmatpush3.bf16.msra.mxu1 %v954_v17 }
  0xb0   :  { %866 = vmatprep.subr.bf16.mxu0 %v1203_v0  ;;  %886 = vmatprep.subr.bf16.mxu1 %v1203_v0 }
  0xb2   :  { %843 = vmatmul.mubr.bf16.vlgmr.msra.gmra.mrb[0].mxu0 %v228_v19  ;;  %863 = vmatmul.mubr.bf16.vlgmr.msra.gmra.mrb[0].mxu1 %v229_v21 }
  0xb3   :  { %882 = vmatprep.mubr.msk.bf16.mxu0 %vm1204_vm0, %v1203_v0  ;;  %887 = vmatpush3.bf16.msra.mxu1 %v955_v20 }
  0xb4   :  { %902 = vmatprep.mubr.msk.bf16.mxu1 %vm1204_vm0, %v1203_v0  ;;  %888 = vmatprep.subr.bf16.mxu1 %v1203_v0 }
  0xb5   :  { %867 = vmatpush3.bf16.msra.mxu0 %v963_v29 }
  0xb6   :  { %868 = vmatprep.subr.bf16.mxu0 %v1203_v0 }
  0xb7   :  { %889 = vmatpush3.bf16.msra.mxu1 %v956_v22 }
  0xb8   :  { %890 = vmatprep.subr.bf16.mxu1 %v1203_v0 }
  0xb9   :  { %869 = vmatpush3.bf16.msra.mxu0 %v964_v30 }
  0xba   :  { %870 = vmatprep.subr.bf16.mxu0 %v1203_v0 }
  0xbb   :  { %891 = vmatpush3.bf16.msra.mxu1 %v957_v23 }
  0xbc   :  { %892 = vmatprep.subr.bf16.mxu1 %v1203_v0 }
  0xbd   :  { %871 = vmatpush3.bf16.msra.mxu0 %v965_v31 }
  0xbe   :  { %872 = vmatprep.subr.bf16.mxu0 %v1203_v0 }
  0xbf   :  { %893 = vmatpush3.bf16.msra.mxu1 %v958_v24  ;;  %v756_v24 = vld [vmem:[%s1487_s10] ss:$0 sm:$0xff]  ;;  %s1159_s10 = scalar_lea.vmem %s727_s27, 16 }
  0xc0   :  { %894 = vmatprep.subr.bf16.mxu1 %v1203_v0  ;;  %p1160_p8 = scmp.ne.s32.totalorder %s727_s27, %s1159_s10  ;;  %p1165_p10 = scmp.lt.s32.totalorder %s1163_s28, %s1159_s10 }
  0xc1   :  { %873 = vmatpush3.bf16.msra.mxu0 %v966_v32 }
  0xc2   :  { %874 = vmatprep.subr.bf16.mxu0 %v1203_v0  ;;  %p1166_p11 = por %p1165_p10, %p1164_p9 }
  0xc3   :  { %895 = vmatpush3.bf16.msra.mxu1 %v959_v25 }
  0xc4   :  { %896 = vmatprep.subr.bf16.mxu1 %v1203_v0  ;;  %p1167_p12 = pnand %p1166_p11, %p1160_p8 }
  0xc5   :  { %875 = vmatpush3.bf16.msra.mxu0 %v967_v33 }
  0xc6   :  { %876 = vmatprep.subr.bf16.mxu0 %v1203_v0 }
  0xc7   :  { %897 = vmatpush3.bf16.msra.mxu1 %v960_v26 }
  0xc8   :  { %898 = vmatprep.subr.bf16.mxu1 %v1203_v0 }
  0xc9   :  { %877 = vmatpush3.bf16.msra.mxu0 %v968_v34 }
  0xca   :  { %878 = vmatprep.subr.bf16.mxu0 %v1203_v0 }
  0xcb   :  { %899 = vmatpush3.bf16.msra.mxu1 %v961_v27 }
  0xcc   :  { %900 = vmatprep.subr.bf16.mxu1 %v1203_v0 }
  0xcd   :  { %879 = vmatpush3.bf16.msra.mxu0 %v969_v35 }
  0xce   :  { %880 = vmatprep.subr.bf16.mxu0 %v1203_v0 }
  0xcf   :  { %901 = vmatpush3.bf16.msra.mxu1 %v962_v28 }
  0xd1   :  { %881 = vmatpush3.bf16.msra.mxu0 %v970_v36  ;;  %v630_v36 = vld [vmem:[%s1488_s11] sm:$0x1] }
  0xd2   :  { %906 = vmatprep.subr.bf16.mxu0 %v1203_v0 }
  0xd4   :  { %883 = vmatmul.mubr.bf16.vlgmr.msra.gmra.mrb[4].mxu0 %v229_v21 }
  0xd5   :  { %922 = vmatprep.mubr.msk.bf16.mxu0 %vm1204_vm0, %v1203_v0  ;;  %907 = vmatpush3.bf16.msra.mxu0 %v971_v55 }
  0xd6   :  { %908 = vmatprep.subr.bf16.mxu0 %v1203_v0 }
  0xd9   :  { %909 = vmatpush3.bf16.msra.mxu0 %v972_v56 }
  0xda   :  { %910 = vmatprep.subr.bf16.mxu0 %v1203_v0 }
  0xdd   :  { %911 = vmatpush3.bf16.msra.mxu0 %v973_v57 }
  0xde   :  { %912 = vmatprep.subr.bf16.mxu0 %v1203_v0 }
  0xe1   :  { %913 = vmatpush3.bf16.msra.mxu0 %v974_v62 }
  0xe2   :  { %914 = vmatprep.subr.bf16.mxu0 %v1203_v0 }
  0xe5   :  { %915 = vmatpush3.bf16.msra.mxu0 %v975_v63 }
  0xe6   :  { %916 = vmatprep.subr.bf16.mxu0 %v1203_v0 }
  0xe9   :  { %917 = vmatpush3.bf16.msra.mxu0 %v976_v1 }
  0xea   :  { %918 = vmatprep.subr.bf16.mxu0 %v1203_v0 }
  0xed   :  { %919 = vmatpush3.bf16.msra.mxu0 %v977_v2 }
  0xee   :  { %920 = vmatprep.subr.bf16.mxu0 %v1203_v0 }
  0xf1   :  { %921 = vmatpush3.bf16.msra.mxu0 %v978_v3 }
 0x185   :  { %v313_v42 = vpop.f32.mrb[0].mxu0  ;;  %v408_v44 = vpop.f32.mrb[0].mxu1 }
 0x186   :  { %v314_v43 = vadd.f32 %v313_v42, %v230_v39  ;;  %v844_v45 = vpop.f32.mrb[1].mxu0  ;;  %v409_v46 = vadd.f32 %v747_v41, %v408_v44  ;;  %v864_v47 = vpop.f32.mrb[1].mxu1 }
 0x187   :  { %v316_v48 = vpop.f32.mrb[2].mxu0  ;;  %v411_v50 = vpop.f32.mrb[2].mxu1 }
 0x188   :  { %v512_v49 = vrot.slane %v314_v43, %v511_v40  ;;  %v845_v51 = vpop.f32.mrb[3].mxu0  ;;  %v865_v52 = vpop.f32.mrb[3].mxu1 }
 0x18a   :  { %v513_v53 = vmul.f32 %v512_v49, %v409_v46 }
 0x18c   :  { %v514_v54 = vpack.c.bf16 %v513_v53, %v513_v53 }
 0x18e   :  { %903 = vmatmul.mubr.bf16.vlgmr.msra.gmra.mrb[4].mxu1 %v514_v54 }
 0x1a7   :  { %v503_v58 = vpop.f32.mrb[4].mxu0 }
 0x1a8   :  { %v884_v59 = vpop.f32.mrb[5].mxu0  ;;  %v504_v25 = vadd.f32 %v756_v24, %v503_v58 }
 0x1a9   :  { %v506_v60 = vpop.f32.mrb[6].mxu0 }
 0x1aa   :  { %v885_v61 = vpop.f32.mrb[7].mxu0 }
 0x261   :  { %v597_v5 = vpop.f32.mrb[4].mxu1 }
 0x262   :  { %v604_v6 = vadd.f32 %v603_v4, %v597_v5  ;;  %v904_v7 = vpop.f32.mrb[5].mxu1 }
 0x263   :  { %v600_v8 = vpop.f32.mrb[6].mxu1 }
 0x264   :  { %v605_v9 = vrot.slane %v604_v6, 4  ;;  %v905_v10 = vpop.f32.mrb[7].mxu1 }
 0x266   :  { %v606_v11 = vmax.f32 %v604_v6, %v605_v9 }
 0x268   :  { %v607_v12 = vrot.slane %v606_v11, 2 }
 0x26a   :  { %v608_v13 = vmax.f32 %v606_v11, %v607_v12 }
 0x26c   :  { %v609_v14 = vrot.slane %v608_v13, 1 }
 0x26e   :  { %v610_v15 = vmax.f32 %v608_v13, %v609_v14 }
 0x270   :  { %v611_v16 = vsub.f32 %v604_v6, %v610_v15 }
 0x272   :  { %v612_v17 = vmul.f32 1.442695, %v611_v16 }
 0x274   :  { %979 = vpow2.f32 %v612_v17 }
 0x27e   :  { %v980_v18 = vpop.eup %979 }
 0x27f   :  { %v614_v19 = vrot.slane %v980_v18, 4 }
 0x281   :  { %v615_v20 = vadd.f32 %v980_v18, %v614_v19 }
 0x283   :  { %v616_v0 = vrot.slane %v615_v20, 2 }
 0x285   :  { %v617_v21 = vadd.f32 %v616_v0, %v615_v20 }
 0x287   :  { %v618_v22 = vrot.slane %v617_v21, 1 }
 0x289   :  { %v619_v23 = vadd.f32 %v618_v22, %v617_v21 }
 0x28b   :  { %981 = vrcp.f32 %v619_v23 }
 0x295   :  { %v982_v26 = vpop.eup %981 }
 0x296   :  { %v621_v27 = vmul.f32 %v982_v26, %v980_v18 }
 0x298   :  { %v622_v28 = vmul.f32 %v621_v27, %v504_v25 }
 0x29a   :  { %v623_v29 = vrot.slane %v622_v28, 4 }
 0x29c   :  { %v624_v30 = vadd.f32 %v623_v29, %v622_v28 }
 0x29e   :  { %v625_v31 = vrot.slane %v624_v30, 2 }
 0x2a0   :  { %v626_v32 = vadd.f32 %v625_v31, %v624_v30 }
 0x2a2   :  { %v627_v33 = vrot.slane %v626_v32, 1 }
 0x2a4   :  { %v628_v34 = vadd.f32 %v627_v33, %v626_v32 }
 0x2a6   :  { %v629_v35 = vpack.c.bf16 %v628_v34, %v628_v34 }
 0x2a8   :  { %923 = vmatmul.mubr.bf16.vlgmr.msra.gmra.mrb[8].mxu0 %v629_v35 }
 0x37b   :  { %v713_v37 = vpop.f32.mrb[8].mxu0 }
 0x37c   :  { %v714_v38 = vadd.f32 %v713_v37, %v630_v36  ;;  %v924_v39 = vpop.f32.mrb[9].mxu0 }
 0x37d   :  { %v716_v40 = vpop.f32.mrb[10].mxu0 }
 0x37e   :  { %719 = vst [vmem:[#allocation16] sm:$0x1] %v714_v38  ;;  %v925_v41 = vpop.f32.mrb[11].mxu0 }
 0x37f   :  { %1170 = shalt.err (!%p1167_p12)
}
 0x380   :  { %s1171_s11 = scalar_lea.hbm %s1489_s12, 16 }
 0x381   :  { %p1172_p13 = scmp.ne.s32.totalorder %s1489_s12, %s1171_s11  ;;  %p1175_p0 = scmp.lt.u32.totalorder %s1171_s11, %s1489_s12 }
 0x383   :  { %p1177_p1 = pnand %p1175_p0, %p1172_p13 }
 0x385   :  { %1180 = shalt.err (!%p1177_p1)
}
 0x386   :  { %729 = dma.vmem_to_hbm [thread:$0]  %s727_s27, 16, %s1489_s12, [#allocation4]  }
 0x387   :  { %1191 = dma.done.wait [#allocation4], 16  }
 0x388   :  { %1192 = vsyncadd [#allocation4], 4294967280 }
 0x389   :  { %733 = vsyncpa [#allocation3], 1 }
 0x38a   :  { %734 = vsyncpa [#allocation6], 1 }
 0x38b   :  { %735 = vsyncpa [#allocation9], 1 }
 0x38c   :  { %736 = vsyncpa [#allocation12], 1 }
 0x38d   :  { %737 = vsyncpa [#allocation15], 1 }
 0x38e   :  { %738 = vsyncpa [#allocation4], 1 }

</bundles_post_ra>
